<compile_context>
chip_gen: v7x
topology: tpu7x:2x2x1
jax: 0.10.0
libtpu: 0.0.40
codegen_flags: <defaults>
</compile_context>

<pallas_src>
import functools
import math

import jax
import jax.numpy as jnp
import numpy as np
from jax.experimental import pallas as pl
from jax.experimental.pallas import tpu as pltpu

_SUBLANE = 8
_LANE = 128


def _round_up(x, m):
    return (x + m - 1) // m * m


def _attention_model_kernel(x_ref, wkv_ref, bkv_ref, q_ref, gamma_ref, beta_ref,
                            wf_ref, bf_ref, logits_ref, attn_ref,
                            *, n_keys, b_blk, l_in_c, approx_recip):
    """One grid step == one block of `b_blk` batch elements.

    x_ref      : (b_blk * l_in_c, V_in)  batch+seq flattened; seq padded to l_in_c (x8)
    wkv_ref    : (V_in, H)          bkv_ref : (1, H) f32
    q_ref      : (L_out, H) f32     gamma/beta_ref : (1, H) f32
    wf_ref     : (H, V_out_pad)     bf_ref  : (1, V_out_pad) f32 (zero-padded cols)
    logits_ref : (b_blk, L_out, V_out_pad) f32
    attn_ref   : (b_blk, L_out, l_in_store)   with l_in_store = round_up(L_in, 128)
    """
    L_out, H = q_ref.shape
    v_out_pad = wf_ref.shape[-1]
    l_in_store = attn_ref.shape[-1]
    mxu_dtype = x_ref.dtype   # bf16 on the fast path, f32 on the exact path

    # --- key/value dense: every row of the batch block in a single MXU call -------------
    kv2d = jnp.dot(x_ref[...], wkv_ref[...],
                   preferred_element_type=jnp.float32) + bkv_ref[...]     # (b*Lc, H) f32
    key_val = kv2d.reshape(b_blk, l_in_c, H)
    key_val_mm = key_val.astype(mxu_dtype)                                # einsum operand

    # --- scaled dot-product attention: contract on H of both operands (no transpose) ----
    q = q_ref[...]                                                        # (L_out, H) f32
    qb = jnp.broadcast_to(q, (b_blk, L_out, H))                           # shared query
    inv_scale = 1.0 / math.sqrt(float(H))
    scores = jnp.einsum("bqh,bkh->bqk", qb.astype(mxu_dtype), key_val_mm,
                        preferred_element_type=jnp.float32) * inv_scale   # (b, L_out, Lc)

    # Mask sublane-padded key rows; compiles away when L_in is already a multiple of 8.
    if n_keys != l_in_c:
        key_idx = jax.lax.broadcasted_iota(jnp.int32, scores.shape, 2)
        scores = jnp.where(key_idx < n_keys, scores, jnp.finfo(jnp.float32).min / 2)

    # Numerically-stable softmax (f32).
    m = jnp.max(scores, axis=-1, keepdims=True)
    e = jnp.exp(scores - m)
    denom = jnp.sum(e, axis=-1, keepdims=True)
    if approx_recip:
        attn = e * pl.reciprocal(denom, approx=True)   # EUP slot; ~1e-3 relative error
    else:
        attn = e / denom                               # exact: rows sum to 1

    # Weighted sum over the keys + query residual (residual uses the f32 query).
    dec = jnp.einsum("bqk,bkh->bqh", attn.astype(mxu_dtype), key_val_mm,
                     preferred_element_type=jnp.float32) + qb             # (b, L_out, H)

    # LayerNorm over H (eps=1e-5, affine, biased variance -- matches nn.LayerNorm).
    mu = jnp.mean(dec, axis=-1, keepdims=True)
    var = jnp.mean((dec - mu) ** 2, axis=-1, keepdims=True)
    normed = (dec - mu) * jax.lax.rsqrt(var + 1e-5) * gamma_ref[...] + beta_ref[...]

    # Final dense: all rows of the block in one MXU call; N = V_out_pad is lane-dense.
    logits2d = jnp.dot(normed.reshape(b_blk * L_out, H).astype(mxu_dtype), wf_ref[...],
                       preferred_element_type=jnp.float32) + bf_ref[...]
    logits_ref[...] = logits2d.reshape(b_blk, L_out, v_out_pad).astype(logits_ref.dtype)

    # Lane-dense attn store: concat zero lanes [l_in_c : l_in_store) at the store only.
    attn_out = attn.astype(attn_ref.dtype)
    if l_in_c != l_in_store:
        attn_out = jnp.concatenate(
            [attn_out,
             jnp.zeros((b_blk, L_out, l_in_store - l_in_c), dtype=attn_ref.dtype)],
            axis=-1)
    attn_ref[...] = attn_out


def _const_spec(shape):
    """BlockSpec for a weight/bias block that is identical at every grid step.

    Single-buffered (pl.Buffered(1)) so it is not needlessly double-buffered in VMEM;
    falls back to the default spec on JAX versions without `pipeline_mode`.
    """
    zeros = (0,) * len(shape)

    def idx(b):
        return zeros

    try:
        return pl.BlockSpec(shape, idx, pipeline_mode=pl.Buffered(1))
    except (TypeError, ValueError, AttributeError):
        return pl.BlockSpec(shape, idx)


def attention_model_forward(x, params, *, b_blk=None, use_bf16=True):
    """x: (B, L_in, V_in) f32.  Returns (logits (B, L_out, V_out) f32, attn (B, L_out, L_in))."""
    B, L_in, V_in = x.shape
    wkv, bkv, q, gamma, beta, wf, bf = (
        params["wkv"], params["bkv"], params["query"],
        params["ln_gamma"], params["ln_beta"], params["wf"], params["bf"])
    L_out, H = q.shape
    V_out = wf.shape[1]

    mxu_dtype = jnp.bfloat16 if use_bf16 else jnp.float32
    attn_dtype = jnp.bfloat16 if use_bf16 else jnp.float32
    mxu_bytes = jnp.dtype(mxu_dtype).itemsize
    attn_bytes = jnp.dtype(attn_dtype).itemsize

    L_in_c = _round_up(L_in, _SUBLANE)     # compute-side padding (sublane multiple only)
    L_in_store = _round_up(L_in, _LANE)    # lane-dense attn writeback (padded in-kernel)
    V_out_pad = _round_up(V_out, _LANE)    # lane-dense logits; pad folded into zero Wf/bf cols

    # Generation-aware VMEM budget: ~48 MiB on v7x (64 MiB/TC), ~96 MiB on v5e/v6e (128 MiB).
    try:
        vmem_cap = int(pltpu.get_tpu_info().vmem_capacity_bytes)
    except Exception:
        vmem_cap = 64 * 1024 * 1024
    vmem_budget = min(int(0.75 * vmem_cap), 100 * 1024 * 1024)

    def step_vmem_bytes(b):
        x_blk = b * L_in_c * V_in * mxu_bytes
        logits_blk = b * L_out * V_out_pad * 4
        attn_blk = b * L_out * L_in_store * attn_bytes
        weights = 2 * ((V_in * H + L_out * H + H * V_out_pad) * mxu_bytes
                       + (3 * H + V_out_pad) * 4)
        interm = b * (L_in_c * H + 2 * L_out * L_in_c + 3 * L_out * H) * 4
        return 2 * (x_blk + logits_blk + attn_blk) + weights + interm

    # Batch-block size: >= 2 grid steps whenever B >= 2 (keeps both v7x TCs busy), ~>= 4
    # steps with >= 512 kv-matmul rows per step at real batch sizes, and must fit VMEM.
    if b_blk is None:
        b_blk = max(1, 512 // max(L_in_c, 1))
        if B >= 4:
            b_blk = min(b_blk, B // 4)
    b_blk = max(1, min(int(b_blk), B))
    if B >= 2:
        b_blk = min(b_blk, B // 2)
    while b_blk > 1 and step_vmem_bytes(b_blk) > vmem_budget:
        b_blk -= 1

    B_pad = _round_up(B, b_blk)

    x_p = jnp.pad(x, ((0, B_pad - B), (0, L_in_c - L_in), (0, 0))).astype(mxu_dtype)
    x2d = x_p.reshape(B_pad * L_in_c, V_in)      # flattened for one big kv matmul per step
    wkv_c = wkv.astype(mxu_dtype)
    wf_p = jnp.pad(wf, ((0, 0), (0, V_out_pad - V_out))).astype(mxu_dtype)
    bf_p = jnp.pad(bf, ((0, 0), (0, V_out_pad - V_out)))

    grid = (B_pad // b_blk,)
    kernel = functools.partial(_attention_model_kernel, n_keys=L_in, b_blk=b_blk,
                               l_in_c=L_in_c, approx_recip=use_bf16)

    grid_spec = pltpu.PrefetchScalarGridSpec(
        num_scalar_prefetch=0,
        grid=grid,
        in_specs=[
            pl.BlockSpec((b_blk * L_in_c, V_in), lambda b: (b, 0)),   # x (flattened block)
            _const_spec((V_in, H)),          # Wkv
            _const_spec((1, H)),             # bkv
            _const_spec((L_out, H)),         # query
            _const_spec((1, H)),             # ln gamma
            _const_spec((1, H)),             # ln beta
            _const_spec((H, V_out_pad)),     # Wf (zero-padded cols)
            _const_spec((1, V_out_pad)),     # bf (zero-padded cols)
        ],
        out_specs=[
            pl.BlockSpec((b_blk, L_out, V_out_pad), lambda b: (b, 0, 0)),   # logits
            pl.BlockSpec((b_blk, L_out, L_in_store), lambda b: (b, 0, 0)),  # attn weights
        ],
    )

    logits_p, attn_p = pl.pallas_call(
        kernel,
        out_shape=(
            jax.ShapeDtypeStruct((B_pad, L_out, V_out_pad), jnp.float32),
            jax.ShapeDtypeStruct((B_pad, L_out, L_in_store), attn_dtype),
        ),
        grid_spec=grid_spec,
        compiler_params=pltpu.CompilerParams(
            dimension_semantics=("parallel",),
            vmem_limit_bytes=vmem_budget,
        ),
    )(x2d, wkv_c, bkv, q, gamma, beta, wf_p, bf_p)

    # Strip batch / lane padding.
    return logits_p[:B, :, :V_out], attn_p[:B, :, :L_in]


def _reference_forward(x, params):
    """Pure-JAX f32 reference matching the PyTorch module semantics."""
    wkv, bkv, q, gamma, beta, wf, bf = (
        params["wkv"], params["bkv"], params["query"],
        params["ln_gamma"], params["ln_beta"], params["wf"], params["bf"])
    key_val = x @ wkv + bkv                                        # (B, L_in, H)
    qb = jnp.broadcast_to(q[None], (x.shape[0],) + q.shape)        # repeat over batch
    scale = jnp.sqrt(jnp.float32(q.shape[-1]))
    scores = jnp.einsum("bqh,bkh->bqk", qb, key_val) / scale
    attn = jax.nn.softmax(scores, axis=-1)
    dec = jnp.einsum("bqk,bkh->bqh", attn, key_val) + qb
    mu = jnp.mean(dec, axis=-1, keepdims=True)
    var = jnp.mean((dec - mu) ** 2, axis=-1, keepdims=True)
    normed = (dec - mu) * jax.lax.rsqrt(var + 1e-5) * gamma + beta
    logits = normed @ wf + bf
    return logits, attn


if __name__ == "__main__":
    # Small synthetic shapes consistent with the module:
    B, L_in, V_in = 2, 16, 8          # batch, input sequence length, vocab_in
    L_out, H, V_out = 8, 32, 16       # len_out, hidden, vocab_out

    key = jax.random.PRNGKey(0)
    ks = jax.random.split(key, 6)
    x = jax.random.normal(ks[0], (B, L_in, V_in), dtype=jnp.float32)

    # Deterministic parameter init (module defines shapes; PyTorch zero-inits `query`
    # -- small random values are used so the attention path is exercised non-trivially).
    params = {
        "wkv": 0.1 * jax.random.normal(ks[1], (V_in, H), dtype=jnp.float32),
        "bkv": 0.05 * jax.random.normal(ks[2], (1, H), dtype=jnp.float32),
        "query": 0.1 * jax.random.normal(ks[3], (L_out, H), dtype=jnp.float32),
        "ln_gamma": jnp.ones((1, H), dtype=jnp.float32),
        "ln_beta": jnp.zeros((1, H), dtype=jnp.float32),
        "wf": 0.1 * jax.random.normal(ks[4], (H, V_out), dtype=jnp.float32),
        "bf": 0.05 * jax.random.normal(ks[5], (1, V_out), dtype=jnp.float32),
    }

    ref_logits, ref_attn = _reference_forward(x, params)

    # Exact path: f32 MXU operands + exact softmax divide -> faithful module semantics.
    logits, attn = attention_model_forward(x, params, use_bf16=False)
    jax.block_until_ready((logits, attn))
    assert logits.shape == (B, L_out, V_out) and attn.shape == (B, L_out, L_in)
    assert np.allclose(np.asarray(logits), np.asarray(ref_logits), atol=5e-3, rtol=5e-3)
    assert np.allclose(np.asarray(attn), np.asarray(ref_attn), atol=5e-3, rtol=5e-3)

    # Fast path: bf16 MXU operands / bf16 attn writeback, f32 accumulation & LayerNorm.
    logits_bf, attn_bf = attention_model_forward(x, params, use_bf16=True)
    jax.block_until_ready((logits_bf, attn_bf))
    assert logits_bf.shape == (B, L_out, V_out) and attn_bf.shape == (B, L_out, L_in)
    assert np.allclose(np.asarray(logits_bf), np.asarray(ref_logits), atol=5e-2, rtol=5e-2)
    assert np.allclose(np.asarray(attn_bf.astype(jnp.float32)), np.asarray(ref_attn),
                       atol=5e-2, rtol=5e-2)

    print("KERNEL_OK")
</pallas_src>

<mosaic_0001>
module attributes {stable_mosaic.version = 11 : i64} {
  func.func @_attention_model_kernel(%arg0: i32, %arg1: memref<16x8xf32, #tpu.memory_space<vmem>>, %arg2: memref<8x32xf32, #tpu.memory_space<vmem>>, %arg3: memref<1x32xf32, #tpu.memory_space<vmem>>, %arg4: memref<8x32xf32, #tpu.memory_space<vmem>>, %arg5: memref<1x32xf32, #tpu.memory_space<vmem>>, %arg6: memref<1x32xf32, #tpu.memory_space<vmem>>, %arg7: memref<32x128xf32, #tpu.memory_space<vmem>>, %arg8: memref<1x128xf32, #tpu.memory_space<vmem>>, %arg9: memref<1x8x128xf32, #tpu.memory_space<vmem>>, %arg10: memref<1x8x128xf32, #tpu.memory_space<vmem>>) attributes {dimension_semantics = [#tpu.dimension_semantics<parallel>], iteration_bounds = array<i64: 2>, scalar_prefetch = 0 : i64, scratch_operands = 0 : i64, tpu.core_type = #tpu.core_type<tc>, window_params = [{transform_indices = @transform_0, window_bounds = array<i64: 16, 8>}, {pipeline_mode = #tpu.pipeline_mode<synchronous>, transform_indices = @transform_1, window_bounds = array<i64: 8, 32>}, {pipeline_mode = #tpu.pipeline_mode<synchronous>, transform_indices = @transform_2, window_bounds = array<i64: 1, 32>}, {pipeline_mode = #tpu.pipeline_mode<synchronous>, transform_indices = @transform_3, window_bounds = array<i64: 8, 32>}, {pipeline_mode = #tpu.pipeline_mode<synchronous>, transform_indices = @transform_4, window_bounds = array<i64: 1, 32>}, {pipeline_mode = #tpu.pipeline_mode<synchronous>, transform_indices = @transform_5, window_bounds = array<i64: 1, 32>}, {pipeline_mode = #tpu.pipeline_mode<synchronous>, transform_indices = @transform_6, window_bounds = array<i64: 32, 128>}, {pipeline_mode = #tpu.pipeline_mode<synchronous>, transform_indices = @transform_7, window_bounds = array<i64: 1, 128>}, {transform_indices = @transform_8, window_bounds = array<i64: 1, 8, 128>}, {transform_indices = @transform_9, window_bounds = array<i64: 1, 8, 128>}]} {
    %c0 = arith.constant 0 : index
    %c0_0 = arith.constant 0 : index
    %0 = vector.load %arg1[%c0, %c0_0] : memref<16x8xf32, #tpu.memory_space<vmem>>, vector<16x8xf32>
    %c0_1 = arith.constant 0 : index
    %c0_2 = arith.constant 0 : index
    %1 = vector.load %arg2[%c0_1, %c0_2] : memref<8x32xf32, #tpu.memory_space<vmem>>, vector<8x32xf32>
    %cst = arith.constant dense<0.000000e+00> : vector<16x32xf32>
    %2 = tpu.matmul %0, %1, %cst {dimension_numbers = #tpu.dot_dimension_numbers<[1], [0], [0], [1], [0, 0, 1, 1], [], []>} : vector<16x8xf32>, vector<8x32xf32>, vector<16x32xf32> -> vector<16x32xf32>
    %c0_3 = arith.constant 0 : index
    %c0_4 = arith.constant 0 : index
    %3 = vector.load %arg3[%c0_3, %c0_4] : memref<1x32xf32, #tpu.memory_space<vmem>>, vector<1x32xf32>
    %4 = vector.broadcast %3 : vector<1x32xf32> to vector<16x32xf32>
    %5 = arith.addf %2, %4 : vector<16x32xf32>
    %6 = vector.shape_cast %5 : vector<16x32xf32> to vector<1x16x32xf32>
    %c0_5 = arith.constant 0 : index
    %c0_6 = arith.constant 0 : index
    %7 = vector.load %arg4[%c0_5, %c0_6] : memref<8x32xf32, #tpu.memory_space<vmem>>, vector<8x32xf32>
    %8 = vector.shape_cast %7 : vector<8x32xf32> to vector<1x8x32xf32>
    "tpu.trace_start"() <{level = 10 : i32, message = "bqh,bkh->bqk"}> : () -> ()
    %cst_7 = arith.constant dense<0.000000e+00> : vector<1x8x16xf32>
    %9 = tpu.matmul %8, %6, %cst_7 {dimension_numbers = #tpu.dot_dimension_numbers<[2], [2], [1], [1], [0, 0, 0, 1, 1, 1], [0], [0]>} : vector<1x8x32xf32>, vector<1x16x32xf32>, vector<1x8x16xf32> -> vector<1x8x16xf32>
    "tpu.trace_stop"() : () -> ()
    %cst_8 = arith.constant 0.176776692 : f32
    %10 = vector.broadcast %cst_8 : f32 to vector<1x8x16xf32>
    %11 = arith.mulf %9, %10 : vector<1x8x16xf32>
    %cst_9 = arith.constant dense<0xFF800000> : vector<1x8xf32>
    %12 = vector.multi_reduction <maximumf>, %11, %cst_9 [2] : vector<1x8x16xf32> to vector<1x8xf32>
    %13 = vector.shape_cast %12 : vector<1x8xf32> to vector<1x8x1xf32>
    %14 = vector.broadcast %13 : vector<1x8x1xf32> to vector<1x8x16xf32>
    %15 = arith.subf %11, %14 : vector<1x8x16xf32>
    %16 = math.exp %15 : vector<1x8x16xf32>
    %cst_10 = arith.constant dense<0.000000e+00> : vector<1x8xf32>
    %17 = vector.multi_reduction <add>, %16, %cst_10 [2] : vector<1x8x16xf32> to vector<1x8xf32>
    %18 = vector.shape_cast %17 : vector<1x8xf32> to vector<1x8x1xf32>
    %19 = vector.broadcast %18 : vector<1x8x1xf32> to vector<1x8x16xf32>
    %20 = arith.divf %16, %19 : vector<1x8x16xf32>
    "tpu.trace_start"() <{level = 10 : i32, message = "bqk,bkh->bqh"}> : () -> ()
    %cst_11 = arith.constant dense<0.000000e+00> : vector<1x8x32xf32>
    %21 = tpu.matmul %20, %6, %cst_11 {dimension_numbers = #tpu.dot_dimension_numbers<[2], [1], [1], [2], [0, 0, 0, 1, 1, 2], [0], [0]>} : vector<1x8x16xf32>, vector<1x16x32xf32>, vector<1x8x32xf32> -> vector<1x8x32xf32>
    "tpu.trace_stop"() : () -> ()
    %22 = arith.addf %21, %8 : vector<1x8x32xf32>
    %cst_12 = arith.constant dense<0.000000e+00> : vector<1x8xf32>
    %23 = vector.multi_reduction <add>, %22, %cst_12 [2] : vector<1x8x32xf32> to vector<1x8xf32>
    %24 = vector.shape_cast %23 : vector<1x8xf32> to vector<1x8x1xf32>
    %cst_13 = arith.constant 3.200000e+01 : f32
    %25 = vector.broadcast %cst_13 : f32 to vector<1x8x1xf32>
    %26 = arith.divf %24, %25 : vector<1x8x1xf32>
    %27 = vector.broadcast %26 : vector<1x8x1xf32> to vector<1x8x32xf32>
    %28 = arith.subf %22, %27 : vector<1x8x32xf32>
    %29 = arith.mulf %28, %28 : vector<1x8x32xf32>
    %cst_14 = arith.constant dense<0.000000e+00> : vector<1x8xf32>
    %30 = vector.multi_reduction <add>, %29, %cst_14 [2] : vector<1x8x32xf32> to vector<1x8xf32>
    %31 = vector.shape_cast %30 : vector<1x8xf32> to vector<1x8x1xf32>
    %cst_15 = arith.constant 3.200000e+01 : f32
    %32 = vector.broadcast %cst_15 : f32 to vector<1x8x1xf32>
    %33 = arith.divf %31, %32 : vector<1x8x1xf32>
    %34 = vector.broadcast %26 : vector<1x8x1xf32> to vector<1x8x32xf32>
    %35 = arith.subf %22, %34 : vector<1x8x32xf32>
    %cst_16 = arith.constant 9.99999974E-6 : f32
    %36 = vector.broadcast %cst_16 : f32 to vector<1x8x1xf32>
    %37 = arith.addf %33, %36 : vector<1x8x1xf32>
    %38 = math.rsqrt %37 : vector<1x8x1xf32>
    %39 = vector.broadcast %38 : vector<1x8x1xf32> to vector<1x8x32xf32>
    %40 = arith.mulf %35, %39 : vector<1x8x32xf32>
    %c0_17 = arith.constant 0 : index
    %c0_18 = arith.constant 0 : index
    %41 = vector.load %arg5[%c0_17, %c0_18] : memref<1x32xf32, #tpu.memory_space<vmem>>, vector<1x32xf32>
    %42 = vector.shape_cast %41 : vector<1x32xf32> to vector<1x1x32xf32>
    %43 = vector.broadcast %42 : vector<1x1x32xf32> to vector<1x8x32xf32>
    %44 = arith.mulf %40, %43 : vector<1x8x32xf32>
    %c0_19 = arith.constant 0 : index
    %c0_20 = arith.constant 0 : index
    %45 = vector.load %arg6[%c0_19, %c0_20] : memref<1x32xf32, #tpu.memory_space<vmem>>, vector<1x32xf32>
    %46 = vector.shape_cast %45 : vector<1x32xf32> to vector<1x1x32xf32>
    %47 = vector.broadcast %46 : vector<1x1x32xf32> to vector<1x8x32xf32>
    %48 = arith.addf %44, %47 : vector<1x8x32xf32>
    %49 = vector.shape_cast %48 : vector<1x8x32xf32> to vector<8x32xf32>
    %c0_21 = arith.constant 0 : index
    %c0_22 = arith.constant 0 : index
    %50 = vector.load %arg7[%c0_21, %c0_22] : memref<32x128xf32, #tpu.memory_space<vmem>>, vector<32x128xf32>
    %cst_23 = arith.constant dense<0.000000e+00> : vector<8x128xf32>
    %51 = tpu.matmul %49, %50, %cst_23 {dimension_numbers = #tpu.dot_dimension_numbers<[1], [0], [0], [1], [0, 0, 1, 1], [], []>} : vector<8x32xf32>, vector<32x128xf32>, vector<8x128xf32> -> vector<8x128xf32>
    %c0_24 = arith.constant 0 : index
    %c0_25 = arith.constant 0 : index
    %52 = vector.load %arg8[%c0_24, %c0_25] : memref<1x128xf32, #tpu.memory_space<vmem>>, vector<1x128xf32>
    %53 = vector.broadcast %52 : vector<1x128xf32> to vector<8x128xf32>
    %54 = arith.addf %51, %53 : vector<8x128xf32>
    %55 = vector.shape_cast %54 : vector<8x128xf32> to vector<1x8x128xf32>
    %c0_26 = arith.constant 0 : index
    %c0_27 = arith.constant 0 : index
    %c0_28 = arith.constant 0 : index
    %56 = vector.load %arg9[%c0_26, %c0_27, %c0_28] : memref<1x8x128xf32, #tpu.memory_space<vmem>>, vector<1x8x128xf32>
    tpu.vector_store %arg9[%c0_26, %c0_27, %c0_28], %55 {strides = array<i32>} : memref<1x8x128xf32, #tpu.memory_space<vmem>>, vector<1x8x128xf32>,
    %cst_29 = arith.constant 0.000000e+00 : f32
    %57 = vector.broadcast %cst_29 : f32 to vector<1x8x112xf32>
    %58 = tpu.concatenate %20, %57 in 2 : vector<1x8x16xf32>, vector<1x8x112xf32> -> vector<1x8x128xf32>
    %c0_30 = arith.constant 0 : index
    %c0_31 = arith.constant 0 : index
    %c0_32 = arith.constant 0 : index
    %59 = vector.load %arg10[%c0_30, %c0_31, %c0_32] : memref<1x8x128xf32, #tpu.memory_space<vmem>>, vector<1x8x128xf32>
    tpu.vector_store %arg10[%c0_30, %c0_31, %c0_32], %58 {strides = array<i32>} : memref<1x8x128xf32, #tpu.memory_space<vmem>>, vector<1x8x128xf32>,
    return
  }
  func.func @transform_0(%arg0: i32) -> (i32, i32) {
    %c0_i32 = arith.constant 0 : i32
    %c0_i32_0 = arith.constant 0 : i32
    return %arg0, %c0_i32 : i32, i32
  }
  func.func @transform_1(%arg0: i32) -> (i32, i32) {
    %c0_i32 = arith.constant 0 : i32
    %c0_i32_0 = arith.constant 0 : i32
    %c0_i32_1 = arith.constant 0 : i32
    return %c0_i32, %c0_i32_0 : i32, i32
  }
  func.func @transform_2(%arg0: i32) -> (i32, i32) {
    %c0_i32 = arith.constant 0 : i32
    %c0_i32_0 = arith.constant 0 : i32
    %c0_i32_1 = arith.constant 0 : i32
    return %c0_i32, %c0_i32_0 : i32, i32
  }
  func.func @transform_3(%arg0: i32) -> (i32, i32) {
    %c0_i32 = arith.constant 0 : i32
    %c0_i32_0 = arith.constant 0 : i32
    %c0_i32_1 = arith.constant 0 : i32
    return %c0_i32, %c0_i32_0 : i32, i32
  }
  func.func @transform_4(%arg0: i32) -> (i32, i32) {
    %c0_i32 = arith.constant 0 : i32
    %c0_i32_0 = arith.constant 0 : i32
    %c0_i32_1 = arith.constant 0 : i32
    return %c0_i32, %c0_i32_0 : i32, i32
  }
  func.func @transform_5(%arg0: i32) -> (i32, i32) {
    %c0_i32 = arith.constant 0 : i32
    %c0_i32_0 = arith.constant 0 : i32
    %c0_i32_1 = arith.constant 0 : i32
    return %c0_i32, %c0_i32_0 : i32, i32
  }
  func.func @transform_6(%arg0: i32) -> (i32, i32) {
    %c0_i32 = arith.constant 0 : i32
    %c0_i32_0 = arith.constant 0 : i32
    %c0_i32_1 = arith.constant 0 : i32
    return %c0_i32, %c0_i32_0 : i32, i32
  }
  func.func @transform_7(%arg0: i32) -> (i32, i32) {
    %c0_i32 = arith.constant 0 : i32
    %c0_i32_0 = arith.constant 0 : i32
    %c0_i32_1 = arith.constant 0 : i32
    return %c0_i32, %c0_i32_0 : i32, i32
  }
  func.func @transform_8(%arg0: i32) -> (i32, i32, i32) {
    %c0_i32 = arith.constant 0 : i32
    %c0_i32_0 = arith.constant 0 : i32
    %c0_i32_1 = arith.constant 0 : i32
    return %arg0, %c0_i32, %c0_i32_0 : i32, i32, i32
  }
  func.func @transform_9(%arg0: i32) -> (i32, i32, i32) {
    %c0_i32 = arith.constant 0 : i32
    %c0_i32_0 = arith.constant 0 : i32
    %c0_i32_1 = arith.constant 0 : i32
    return %arg0, %c0_i32, %c0_i32_0 : i32, i32, i32
  }
}

</mosaic_0001>

<bundles_post_ra>
// kernel: tpu_custom_call.1
= control target key start
LH: loop header
LB: loop body
LE: loop exit
PB: predicated region body
PF: predicated region fallthrough
CT: control target
= control target key end

     0   :  { %s1310_s0 = inlined_call_operand.vmem [shape: f32[32,8], index: 0, kind: input, shape index: {}]   ;;  %s1311_s1 = inlined_call_operand.vmem [shape: f32[8,32], index: 1, kind: input, shape index: {}]   ;;  %s1312_s2 = inlined_call_operand.vmem [shape: f32[1,32], index: 2, kind: input, shape index: {}]   ;;  %s1313_s3 = inlined_call_operand.vmem [shape: f32[8,32], index: 3, kind: input, shape index: {}]   ;;  %s1314_s4 = inlined_call_operand.vmem [shape: f32[1,32], index: 4, kind: input, shape index: {}]   ;;  %s1315_s5 = inlined_call_operand.vmem [shape: f32[1,32], index: 5, kind: input, shape index: {}]   ;;  %s1316_s6 = inlined_call_operand.vmem [shape: f32[32,128], index: 6, kind: input, shape index: {}]   ;;  %s1317_s7 = inlined_call_operand.vmem [shape: f32[1,128], index: 7, kind: input, shape index: {}]   ;;  %s1318_s8 = inlined_call_operand.hbm [shape: f32[2,8,128], index: 8, kind: output, shape index: {0}]   ;;  %s1319_s9 = inlined_call_operand.hbm [shape: f32[2,8,128], index: 9, kind: output, shape index: {1}]  }
   0x1   :  { %1322 = sst [smem:[#allocation8_spill]] %s1310_s0 }
   0x2   :  { %15 = vsyncpa [#allocation3], 0 }
   0x3   :  { %17 = vsyncpa [#allocation3 + $0x1], 0 }
   0x4   :  { %18 = vsyncpa [#allocation5], 0 }
   0x5   :  { %20 = vsyncpa [#allocation5 + $0x1], 0  ;;  %s1129_s30 = smov 0   ;;  %s1131_s10 = smov 0  }
   0x6   :  { %s1133_s11 = smov 0   ;;  %s1135_s12 = smov 0  }
   0x7 LB: > { %s1150_s13 = sadd.s32 4294967295, %s1072_s12   ;;  %s843_s14 = sadd.s32 4294967294, %s1072_s12   ;;  %s1072_s12 = sphi %s1135_s12, %s1331_s12   ;;  %s1068_s11 = sphi %s1133_s11, %s1330_s11   ;;  %s1064_s10 = sphi %s1131_s10, %s1329_s10   ;;  %s1060_s30 = sphi %s1129_s30, %s1328_s30  }
   0x8   : > { %s1154_s15 = sadd.s32 1, %s1072_s12   ;;  %s206_s16 = sadd.s32 1, %s1068_s11 }
   0x9   : > { %s203_s17 = ssub.s32 %s1072_s12, %s1154_s15  ;;  %p216_p0 = scmp.ne.s32.totalorder %s1068_s11, %s1064_s10 }
   0xa   : > { %p204_p1 = scmp.eq.s32.totalorder %s203_s17, 0  ;;  %p217_p2 = scmp.eq.s32.totalorder %s1150_s13, 1 }
   0xb   : > { %p222_p3 = scmp.ne.s32.totalorder %s1064_s10, %s1060_s30  ;;  %p223_p4 = scmp.eq.s32.totalorder %s843_s14, 1 }
   0xc   : > { %s1165_s18 = scalar_select %p204_p1, %s1068_s11, %s206_s16  }
   0xd   : > { %p1167_p5 = por %p217_p2, %p216_p0  ;;  %p1171_p6 = por %p223_p4, %p222_p3 }
   0xe   : > { %p846_p7 = scmp.ge.s32.totalorder %s1072_s12, 1  ;;  %p297_p8 = scmp.lt.s32.totalorder %s1072_s12, 3 }
  0x10   : > { %p298_p9 = pnand %p846_p7, %p297_p8 }
  0x11   : > { %v346_v0 = vld [vmem:[%s1311_s1] sm:$0xff] (!%p298_p9)  ;;  %s849_s23 = sshll.u32 (!%p298_p9), %s1150_s13, 1  ;;  %vm354_vm0 = vcmask (!%p298_p9), 64512   ;;  %s1325_s0 = sld [smem:[#allocation8_spill]] (!%p298_p9)  ;;  %v1074_v3 = vmov (!%p298_p9), 0.0|0.0   ;;  %vm1075_vm1 = vmmov (!%p298_p9), 0  }
  0x12   : > { %301 = sbr.rel (%p298_p9) target bundleno = 1537 (0x601), region = 52  ;;  %882 = vmatprep.subr.mxu1 (!%p298_p9), %v346_v0  ;;  %p339_p10 = scmp.lt.s32.totalorder (!%p298_p9), %s849_s23, 3  ;;  %916 = vmatprep.subr.bf16.mxu0 (!%p298_p9), %v1074_v3  ;;  %v1076_v4 = vmov (!%p298_p9), 0.0   ;;  %v851_v5 = vld [vmem:[%s1312_s2] ss:$0 sm:$0xff] (!%p298_p9)  ;;  %vm437_vm2 = vcmask (!%p298_p9), 261120  }
  0x13   : > { %883 = vmatpush3.msra.mxu1 (!%p298_p9), %v346_v0  ;;  %898 = vmatprep.mubr.msk.f32.mxu0 (!%p298_p9), %vm1075_vm1, %v1076_v4  ;;  %vm914_vm3 = vmpackc.low (!%p298_p9), %vm437_vm2, %vm437_vm2  ;;  %v436_v11 = vld [vmem:[%s1313_s3] sm:$0xff] (!%p298_p9)  ;;  %vm518_vm4 = vcmask (!%p298_p9), 130048   ;;  %s1198_s17 = sand.u32 (!%p298_p9), 1, %s1064_s10   ;;  %v634_v35 = vld [vmem:[%s1316_s6 + $0x8] sm:$0xff] (!%p298_p9)  ;;  %s1321_s26 = sshll.u32 (!%p298_p9), %s1150_s13, 7 }
  0x14   : > { %912 = vmatprep.subr.bf16.mxu1 (!%p298_p9), %v1074_v3  ;;  %s1320_s21 = sshll.u32 (!%p298_p9), %s1198_s17, 3  ;;  %v633_v34 = vld [vmem:[%s1316_s6] sm:$0xff] (!%p298_p9)  ;;  %v635_v37 = vld [vmem:[%s1316_s6 + $0x10] sm:$0xff] (!%p298_p9)  ;;  %v636_v38 = vld [vmem:[%s1316_s6 + $0x18] sm:$0xff] (!%p298_p9)  ;;  %s1236_s29 = scalar_lea.hbm (!%p298_p9), %s1319_s9, %s1321_s26 }
  0x15   : > { %s1206_s22 = scalar_lea.vmem (!%p298_p9), [#allocation4], %s1320_s21  ;;  %v920_v36 = vpack.c.bf16 (!%p298_p9), %v634_v35, %v633_v34  ;;  %v923_v39 = vpack.c.bf16 (!%p298_p9), %v636_v38, %v635_v37  ;;  %v858_v44 = vld [vmem:[%s1314_s4] ss:$0 sm:$0xff] (!%p298_p9)  ;;  %s726_s16 = scalar_lea.sflag (!%p298_p9), [#allocation5], %s1198_s17 }
  0x16   : > { %v859_v46 = vld [vmem:[%s1315_s5] ss:$0 sm:$0xff] (!%p298_p9)  ;;  %s752_s14 = sshll.u32 (!%p298_p9), %s1206_s22, 4  ;;  %s753_s14 = int_to_ptr.vmem [resolvable:$true] %s752_s14 }
  0x19   : > { %s1333_s23 = smov (!%p339_p10, %s849_s23), 3 }
  0x1a   : > { %s850_s24 = sshll.u32 %s1333_s23, 3  ;;  %s978_s23 = scalar_lea.vmem %s753_s14, 128 }
  0x1b   : > { %s342_s27 = scalar_lea.vmem %s1325_s0, %s850_s24  ;;  %p979_p11 = scmp.ne.s32.totalorder %s753_s14, %s978_s23 }
  0x1c   : > { %v344_v1 = vld [vmem:[%s342_s27] sm:$0xff]  ;;  %v345_v2 = vld [vmem:[%s342_s27 + $0x8] sm:$0xff]  ;;  %s1077_s24 = smov [#allocation4]  }
  0x1d   : > { %884 = vmatprep.mubr.msk.f32.mxu1 %vm354_vm0, %v344_v1  ;;  %p980_p12 = pnand %p979_p11, %p1167_p5  ;;  %s982_s25 = sshll.u32 %s1077_s24, 4  ;;  %s983_s25 = int_to_ptr.vmem [resolvable:$false] %s982_s25 }
  0x1e   : > { %885 = vmatmul.mubr.msk.f32.vlgmr.msra.gmra.mrb[0].mxu1 %vm354_vm0, %v345_v2  ;;  %s984_s21 = scalar_lea.vmem %s983_s25, 256  ;;  %p985_p0 = scmp.lt.s32.totalorder %s753_s14, %s983_s25 }
  0x1f   : > { %891 = vmatprep.mubr.msk.f32.mxu1 %vm1075_vm1, %v1076_v4  ;;  %p981_p13 = pneg %p980_p12  ;;  %p986_p1 = scmp.lt.s32.totalorder %s984_s21, %s978_s23 }
  0x21   : > { %p987_p2 = por %p986_p1, %p985_p0 }
  0x23   : > { %p988_p3 = pnand %p987_p2, %p981_p13 }
  0xf1   : > { %v886_v6 = vpop.f32.mrb[0].mxu1 }
  0xf2   : > { %v433_v7 = vadd.f32 %v886_v6, %v851_v5  ;;  %v427_v8 = vpop.f32.mrb[1].mxu1 }
  0xf3   : > { %v428_v9 = vadd.f32 %v851_v5, %v427_v8 }
  0xf5   : > { %v913_v10 = vpack.c.bf16 %v433_v7, %v428_v9 }
  0xf7   : > { %915 = vmatpush3.bf16.xpose.msk.msra.mxu1 %vm914_vm3, %v913_v10  ;;  %918 = vmatpush3.bf16.msra.mxu0 %v913_v10 }
  0xf8   : > { %919 = vmatprep.subr.bf16.mxu0 %v1074_v3 }
  0xfe   : > { %892 = vmatmul.mubr.msk.f32.vlgmr.msra.gmra.mrb[2].mxu1 %vm437_vm2, %v436_v11 }
 0x1d1   : > { %v513_v12 = vpop.f32.mrb[2].mxu1 }
 0x1d2   : > { %v517_v13 = vmul.f32 0.17677669, %v513_v12  ;;  %v893_v14 = vpop.f32.mrb[3].mxu1 }
 0x1d4   : > { %v519_v15 = vsel %vm518_vm4, %v517_v13, -inf }
 0x1d5   : > { %520 = vmax.xlane.f32.xlu0 %v519_v15 }
 0x262   : > { %v521_v16 = vpop.xlane.xlu0 %520 }
 0x263   : > { %v522_v17 = vsub.f32 %v517_v13, %v521_v16 }
 0x265   : > { %v523_v18 = vmul.f32 1.442695, %v522_v17 }
 0x267   : > { %972 = vpow2.f32 %v523_v18 }
 0x271   : > { %v973_v19 = vpop.eup %972 }
 0x272   : > { %v525_v20 = vsel %vm518_vm4, %v973_v19, 0.0 }
 0x273   : > { %526 = vadd.xlane.f32.xlu0 %v525_v20 }
 0x300   : > { %v527_v21 = vpop.xlane.xlu0 %526 }
 0x301   : > { %974 = vrcp.f32 %v527_v21 }
 0x30b   : > { %v975_v22 = vpop.eup %974 }
 0x30c   : > { %v529_v23 = vmul.f32 %v975_v22, %v973_v19 }
 0x30e   : > { %899 = vmatmul.mubr.msk.f32.vlgmr.msra.gmra.mrb[0].mxu0 %vm518_vm4, %v529_v23  ;;  %v718_v24 = vsel %vm518_vm4, %v529_v23, 0.0 }
 0x30f   : > { %909 = vmatprep.mubr.msk.f32.mxu0 %vm1075_vm1, %v1076_v4  ;;  %719 = vst [vmem:[%s1206_s22] sm:$0xff] %v718_v24  ;;  %921 = vmatpush3.bf16.msra.mxu0 %v920_v36 }
 0x310   : > { %922 = vmatprep.subr.bf16.mxu0 %v1074_v3 }
 0x313   : > { %924 = vmatpush3.bf16.msra.mxu0 %v923_v39 }
 0x3e1   : > { %v599_v25 = vpop.f32.mrb[0].mxu0 }
 0x3e2   : > { %v600_v26 = vadd.f32 %v599_v25, %v436_v11  ;;  %v900_v27 = vpop.f32.mrb[1].mxu0 }
 0x3e4   : > { %v603_v28 = vsel %vm437_vm2, %v600_v26, 0.0 }
 0x3e5   : > { %604 = vadd.xlane.f32.xlu1 %v603_v28 }
 0x472   : > { %v605_v29 = vpop.xlane.xlu1 %604 }
 0x473   : > { %v607_v30 = vmul.f32 0.03125, %v605_v29 }
 0x475   : > { %v608_v31 = vsub.f32 %v600_v26, %v607_v30 }
 0x477   : > { %v609_v32 = vmul.f32 %v608_v31, %v608_v31 }
 0x479   : > { %v610_v33 = vsel %vm437_vm2, %v609_v32, 0.0 }
 0x47a   : > { %611 = vadd.xlane.f32.xlu1 %v610_v33 }
 0x507   : > { %v612_v40 = vpop.xlane.xlu1 %611 }
 0x508   : > { %v613_v41 = vmul.f32 0.03125, %v612_v40 }
 0x50a   : > { %v614_v42 = vadd.f32 1e-05, %v613_v41 }
 0x50c   : > { %976 = vrsqrt.f32 %v614_v42 }
 0x516   : > { %v977_v43 = vpop.eup %976 }
 0x517   : > { %v616_v45 = vmul.f32 %v977_v43, %v608_v31 }
 0x519   : > { %v624_v47 = vmul.f32 %v858_v44, %v616_v45 }
 0x51b   : > { %v632_v48 = vadd.f32 %v859_v46, %v624_v47 }
 0x51d   : > { %910 = vmatmul.mubr.msk.f32.vlgmr.msra.gmra.mrb[2].mxu0 %vm437_vm2, %v632_v48 }
 0x51e   : > { %991 = shalt.err (!%p988_p3)
}
 0x51f   : > { %s992_s22 = scalar_lea.hbm %s1236_s29, 128  ;;  %s996_s24 = scalar_lea.hbm %s1319_s9, 256 }
 0x520   : > { %p993_p4 = scmp.ne.s32.totalorder %s1236_s29, %s992_s22  ;;  %p997_p9 = scmp.lt.u32.totalorder %s1236_s29, %s1319_s9 }
 0x521   : > { %p998_p10 = scmp.lt.u32.totalorder %s996_s24, %s992_s22  ;;  %p1000_p12 = scmp.lt.u32.totalorder %s992_s22, %s1236_s29 }
 0x522   : > { %p994_p7 = pnand %p993_p4, %p1167_p5 }
 0x523   : > { %p999_p11 = por %p998_p10, %p997_p9 }
 0x524   : > { %p995_p8 = pneg %p994_p7 }
 0x525   : > { %p1001_p13 = por %p1000_p12, %p999_p11 }
 0x527   : > { %p1002_p0 = pnand %p1001_p13, %p995_p8 }
 0x529   : > { %1005 = shalt.err (!%p1002_p0)
}
 0x52a   : > { %926 = dma.vmem_to_hbm [thread:$0]  (%p1167_p5), %s753_s14, 128, %s1236_s29, %s726_s16   ;;  %v860_v49 = vld [vmem:[%s1317_s7] ss:$0 sm:$0xff] }
 0x52b   : > { %s1326_s26 = sshll.u32 %s1198_s17, 3  ;;  %s1327_s22 = sshll.u32 %s1150_s13, 7 }
 0x52c   : > { %s330_s27 = scalar_lea.vmem [#allocation2], %s1326_s26  ;;  %s1267_s0 = scalar_lea.hbm %s1318_s8, %s1327_s22 }
 0x52d   : > { %s739_s28 = sshll.u32 %s330_s27, 4  ;;  %s721_s29 = scalar_lea.sflag [#allocation3], %s1198_s17  ;;  %s1269_s28 = int_to_ptr.vmem [resolvable:$true] %s739_s28 }
 0x52e   : > { %s1006_s14 = scalar_lea.vmem %s1269_s28, 128  ;;  %s1078_s16 = smov [#allocation2]  }
 0x52f   : > { %p1007_p1 = scmp.ne.s32.totalorder %s1269_s28, %s1006_s14  ;;  %s1010_s21 = sshll.u32 %s1078_s16, 4  ;;  %s1011_s21 = int_to_ptr.vmem [resolvable:$false] %s1010_s21 }
 0x530   : > { %s1012_s13 = scalar_lea.vmem %s1011_s21, 256  ;;  %p1013_p4 = scmp.lt.s32.totalorder %s1269_s28, %s1011_s21 }
 0x531   : > { %p1008_p2 = pnand %p1007_p1, %p1167_p5  ;;  %p1014_p7 = scmp.lt.s32.totalorder %s1012_s13, %s1006_s14 }
 0x533   : > { %p1009_p3 = pneg %p1008_p2  ;;  %p1015_p8 = por %p1014_p7, %p1013_p4 }
 0x535   : > { %p1016_p9 = pnand %p1015_p8, %p1009_p3 }
 0x5f0   : > { %v713_v50 = vpop.f32.mrb[2].mxu0 }
 0x5f1   : > { %v714_v51 = vadd.f32 %v860_v49, %v713_v50  ;;  %v911_v52 = vpop.f32.mrb[3].mxu0 }
 0x5f3   : > { %717 = vst [vmem:[%s330_s27] sm:$0xff] %v714_v51 }
 0x5f4   : > { %1019 = shalt.err (!%p1016_p9)
}
 0x5f5   : > { %s1020_s17 = scalar_lea.hbm %s1267_s0, 128  ;;  %s1024_s27 = scalar_lea.hbm %s1318_s8, 256 }
 0x5f6   : > { %p1021_p10 = scmp.ne.s32.totalorder %s1267_s0, %s1020_s17  ;;  %p1025_p13 = scmp.lt.u32.totalorder %s1267_s0, %s1318_s8 }
 0x5f7   : > { %p1026_p0 = scmp.lt.u32.totalorder %s1024_s27, %s1020_s17  ;;  %p1028_p2 = scmp.lt.u32.totalorder %s1020_s17, %s1267_s0 }
 0x5f8   : > { %p1022_p11 = pnand %p1021_p10, %p1167_p5 }
 0x5f9   : > { %p1027_p1 = por %p1026_p0, %p1025_p13 }
 0x5fa   : > { %p1023_p12 = pneg %p1022_p11 }
 0x5fb   : > { %p1029_p3 = por %p1028_p2, %p1027_p1 }
 0x5fd   : > { %p1030_p4 = pnand %p1029_p3, %p1023_p12 }
 0x5ff   : > { %1033 = shalt.err (!%p1030_p4)
}
 0x600   : > { %925 = dma.vmem_to_hbm [thread:$0]  (%p1167_p5), %s1269_s28, 128, %s1267_s0, %s721_s29  }
 0x601 PF: > { %p936_p7 = scmp.ge.s32.totalorder %s1072_s12, 2  ;;  %s764_s25 = sand.u32 1, %s1060_s30  }
 0x602   : > { %s765_s14 = scalar_lea.sflag [#allocation3], %s764_s25 }
 0x603   : > { %p930_p8 = pnand %p936_p7, %p1171_p6 }
 0x605   : > { %1051 = dma.done.wait (!%p930_p8), %s765_s14, 128  }
 0x606   : > { %1053 = vsyncadd (!%p930_p8), %s765_s14, 4294967168  ;;  %s774_s16 = scalar_lea.sflag [#allocation5], %s764_s25 }
 0x607   : > { %1055 = dma.done.wait (!%p930_p8), %s774_s16, 128  }
 0x608   : > { %1057 = vsyncadd (!%p930_p8), %s774_s16, 4294967168  ;;  %p23_p5 = scmp.ge.s32.totalorder %s1154_s15, 4   ;;  %s1328_s30 = smov %s1064_s10 }
 0x609   : > { %s1329_s10 = smov %s1068_s11  ;;  %s1330_s11 = smov %s1165_s18 }
 0x60a   : > { %s1331_s12 = smov %s1154_s15  ;;  %25 = sbr.rel (!%p23_p5) target bundleno = 7 (0x7), region = 104 }
 0x611   :  { %779 = vsyncpa [#allocation3], 1 }
 0x612   :  { %781 = vsyncpa [#allocation3 + $0x1], 1 }
 0x613   :  { %782 = vsyncpa [#allocation5], 1 }
 0x614   :  { %784 = vsyncpa [#allocation5 + $0x1], 1 }

</bundles_post_ra>
